<compile_context>
chip_gen: v7x
topology: tpu7x:2x2x1
jax: 0.10.0
libtpu: 0.0.40
codegen_flags: <defaults>
</compile_context>

<pallas_src>
import functools

import jax
import jax.numpy as jnp
import numpy as np
from jax import lax
from jax.experimental import pallas as pl
from jax.experimental.pallas import tpu as pltpu

EPS = 1e-5                  # nn.BatchNorm1d default eps
DILATIONS = (1, 2, 4, 8)


# ----------------------------- Pallas kernel ------------------------------ #

def _block_kernel(x_ref, wc1_ref, g1_ref, b1_ref, a1_ref,
                  wcomb_ref, g2_ref, b2_ref, a2_ref, o_ref, *, add):
    N, nIn, L = x_ref.shape
    n = wc1_ref.shape[0]
    NL = N * L
    inv = 1.0 / float(NL)
    alpha1 = a1_ref[0, 0]
    alpha2 = a2_ref[0, 0]

    # ---- fold batch into the lane axis: one (C, N*L) slab ------------------
    x2 = jnp.concatenate([x_ref[i] for i in range(N)], axis=1)     # (nIn, NL)

    # ---- c1: 1x1 conv == single channel matmul (bias dropped: absorbed by
    #      train-mode BN1's batch mean, exactly) ------------------------------
    h0 = jnp.dot(wc1_ref[...], x2, preferred_element_type=jnp.float32)  # (n, NL)

    # ---- BN1 (batch stats, biased var) + PReLU, single pass -----------------
    s1 = jnp.sum(h0, axis=1, keepdims=True)
    ss1 = jnp.sum(h0 * h0, axis=1, keepdims=True)
    mean1 = s1 * inv
    var1 = ss1 * inv - mean1 * mean1
    scale1 = lax.rsqrt(var1 + EPS) * g1_ref[...]
    shift1 = b1_ref[...] - mean1 * scale1
    h = h0 * scale1 + shift1
    h = jnp.where(h >= 0, h, alpha1 * h)                            # (n, NL)

    # ---- shifted taps via XLU roll + edge masks (no pad-concat, no
    #      misaligned lane slices).  pos = lane position within its batch
    #      segment; masking both zero-pads the conv edges and cancels the
    #      cross-batch wrap of the folded slab. ------------------------------
    pos = lax.broadcasted_iota(jnp.int32, (n, NL), 1) % L
    taps = [h]                                                      # center tap
    for d in DILATIONS:
        left = jnp.where(pos >= d, pltpu.roll(h, d, axis=1), 0.0)          # h[l-d]
        right = jnp.where(pos < (L - d), pltpu.roll(h, NL - d, axis=1), 0.0)  # h[l+d]
        taps.append(left)
        taps.append(right)
    xcat = jnp.concatenate(taps, axis=0)                            # (9n, NL)

    # ---- one fused matmul = all 4 dilated convs + hierarchical adds ---------
    comb = jnp.dot(wcomb_ref[...], xcat,
                   preferred_element_type=jnp.float32)              # (nOut, NL)

    # ---- residual add (only when nIn == nOut) -------------------------------
    if add:
        comb = comb + x2

    # ---- BN2 (batch stats) + PReLU, single pass -----------------------------
    s2 = jnp.sum(comb, axis=1, keepdims=True)
    ss2 = jnp.sum(comb * comb, axis=1, keepdims=True)
    mean2 = s2 * inv
    var2 = ss2 * inv - mean2 * mean2
    scale2 = lax.rsqrt(var2 + EPS) * g2_ref[...]
    shift2 = b2_ref[...] - mean2 * scale2
    y = comb * scale2 + shift2
    y = jnp.where(y >= 0, y, alpha2 * y)                            # (nOut, NL)

    # ---- one dense (nOut, L) store per batch (no sub-tile channel stores) ---
    for i in range(N):
        o_ref[i, :, :] = y[:, i * L:(i + 1) * L].astype(o_ref.dtype)


# ------------------------------ JAX wrapper -------------------------------- #

def dilated_parallel_residual_block_b(x_ncl, kparams, add=True):
    """x_ncl: (N, nIn, L) float32, PyTorch Conv1d layout (kept end-to-end)."""
    N, nIn, L = x_ncl.shape
    nOut = kparams["bn2_g"].shape[0]
    if nIn != nOut:
        add = False

    vmem = pl.BlockSpec(memory_space=pltpu.MemorySpace.VMEM)
    smem = pl.BlockSpec(memory_space=pltpu.MemorySpace.SMEM)
    in_specs = [vmem,                    # x (channels-first, no transpose)
                vmem,                    # c1 weight
                vmem, vmem, smem,        # bn1 gamma / beta, prelu1 alpha
                vmem,                    # fused combined conv weight
                vmem, vmem, smem]        # bn2 gamma / beta, prelu2 alpha

    kernel = functools.partial(_block_kernel, add=add)
    return pl.pallas_call(
        kernel,
        out_shape=jax.ShapeDtypeStruct((N, nOut, L), jnp.float32),
        in_specs=in_specs,
        out_specs=vmem,
        compiler_params=pltpu.CompilerParams(
            # explicit scoped-VMEM budget, safe on v5e/v6e/v7x (<= 64 MiB phys)
            vmem_limit_bytes=32 * 1024 * 1024),
    )(x_ncl.astype(jnp.float32),
      kparams["c1_w"],
      kparams["bn1_g"], kparams["bn1_b"], kparams["prelu1_a"],
      kparams["w_comb"],
      kparams["bn2_g"], kparams["bn2_b"], kparams["prelu2_a"])


# ------------------- combined-weight construction (host) ------------------- #

def _build_combined_weight(w_d1, w_d2, w_d4, w_d8):
    """Fold the four dilated 3-tap convs AND the hierarchical adds into one
    (nOut, 9n) matrix applied to the stacked operand
        [h, L1, R1, L2, R2, L4, R4, L8, R8]   (each block = n rows),
    where Ld/Rd are h shifted by -d/+d along L with zero edge fill and the
    center tap h is shared across all dilations."""
    n1, n, _ = w_d1.shape
    nOut = n1 + 3 * n
    W = np.zeros((nOut, 9 * n), np.float32)
    col = {"c": 0, "L1": 1, "R1": 2, "L2": 3, "R2": 4,
           "L4": 5, "R4": 6, "L8": 7, "R8": 8}

    def put(rows, cblock, mat):
        c0 = col[cblock] * n
        W[rows, c0:c0 + n] += mat

    b0 = slice(0, n1)                    # d1
    b1 = slice(n1, n1 + n)               # add1 = d2
    b2 = slice(n1 + n, n1 + 2 * n)       # add2 = d2 + d4
    b3 = slice(n1 + 2 * n, nOut)         # add3 = d2 + d4 + d8

    put(b0, "L1", w_d1[:, :, 0]); put(b0, "c", w_d1[:, :, 1]); put(b0, "R1", w_d1[:, :, 2])
    for blk in (b1, b2, b3):
        put(blk, "L2", w_d2[:, :, 0]); put(blk, "c", w_d2[:, :, 1]); put(blk, "R2", w_d2[:, :, 2])
    for blk in (b2, b3):
        put(blk, "L4", w_d4[:, :, 0]); put(blk, "c", w_d4[:, :, 1]); put(blk, "R4", w_d4[:, :, 2])
    put(b3, "L8", w_d8[:, :, 0]); put(b3, "c", w_d8[:, :, 1]); put(b3, "R8", w_d8[:, :, 2])
    return jnp.asarray(W)


# ------------------- deterministic parameter initialization ---------------- #

def init_params(key, nIn, nOut):
    n = nOut // 4
    n1 = nOut - 3 * n
    ks = jax.random.split(key, 6)
    # PyTorch layouts: Conv1d weight (out, in, k)
    w_c1 = jax.random.normal(ks[0], (n, nIn, 1), jnp.float32) * 0.2
    b_c1 = jax.random.normal(ks[1], (n,), jnp.float32) * 0.1
    w_d1 = jax.random.normal(ks[2], (n1, n, 3), jnp.float32) * 0.2
    w_d2 = jax.random.normal(ks[3], (n, n, 3), jnp.float32) * 0.2
    w_d4 = jax.random.normal(ks[4], (n, n, 3), jnp.float32) * 0.2
    w_d8 = jax.random.normal(ks[5], (n, n, 3), jnp.float32) * 0.2
    bn1_g = 1.0 + 0.10 * jnp.arange(n, dtype=jnp.float32)
    bn1_b = 0.05 * jnp.arange(n, dtype=jnp.float32)
    bn2_g = 1.0 + 0.05 * jnp.arange(nOut, dtype=jnp.float32)
    bn2_b = -0.02 * jnp.arange(nOut, dtype=jnp.float32)
    prelu1 = jnp.full((1, 1), 0.25, jnp.float32)   # nn.PReLU default init
    prelu2 = jnp.full((1, 1), 0.25, jnp.float32)

    torch_p = dict(w_c1=w_c1, b_c1=b_c1, w_d1=w_d1, w_d2=w_d2, w_d4=w_d4,
                   w_d8=w_d8, bn1_g=bn1_g, bn1_b=bn1_b, bn2_g=bn2_g,
                   bn2_b=bn2_b, prelu1=prelu1, prelu2=prelu2)

    # NOTE: the c1 bias is intentionally NOT passed to the kernel — a
    # per-channel constant bias is exactly cancelled by train-mode BN1.
    kern_p = dict(
        c1_w=w_c1[:, :, 0],                                  # (n, nIn)
        bn1_g=bn1_g[:, None], bn1_b=bn1_b[:, None],
        prelu1_a=prelu1,
        w_comb=_build_combined_weight(np.asarray(w_d1), np.asarray(w_d2),
                                      np.asarray(w_d4), np.asarray(w_d8)),
        bn2_g=bn2_g[:, None], bn2_b=bn2_b[:, None],
        prelu2_a=prelu2,
    )
    return torch_p, kern_p


# --------------------------- pure-JAX reference ----------------------------- #

def _conv1d_ref(x, w, b=None, d=1, pad=0):
    y = lax.conv_general_dilated(
        x, w, window_strides=(1,), padding=[(pad, pad)], rhs_dilation=(d,),
        dimension_numbers=("NCH", "OIH", "NCH"),
        precision=lax.Precision.HIGHEST)
    if b is not None:
        y = y + b[None, :, None]
    return y


def _bn_prelu_ref(x, gamma, beta, alpha):
    mean = jnp.mean(x, axis=(0, 2), keepdims=True)
    var = jnp.mean((x - mean) ** 2, axis=(0, 2), keepdims=True)
    y = (x - mean) / jnp.sqrt(var + EPS) * gamma[None, :, None] + beta[None, :, None]
    return jnp.where(y >= 0, y, alpha * y)


def reference_forward(x, tp, add=True):
    o1 = _conv1d_ref(x, tp["w_c1"], tp["b_c1"])
    o1 = _bn_prelu_ref(o1, tp["bn1_g"], tp["bn1_b"], tp["prelu1"][0, 0])
    d1 = _conv1d_ref(o1, tp["w_d1"], None, d=1, pad=1)
    d2 = _conv1d_ref(o1, tp["w_d2"], None, d=2, pad=2)
    d4 = _conv1d_ref(o1, tp["w_d4"], None, d=4, pad=4)
    d8 = _conv1d_ref(o1, tp["w_d8"], None, d=8, pad=8)
    add1 = d2
    add2 = add1 + d4
    add3 = add2 + d8
    combine = jnp.concatenate([d1, add1, add2, add3], axis=1)
    if add:
        combine = x + combine
    return _bn_prelu_ref(combine, tp["bn2_g"], tp["bn2_b"], tp["prelu2"][0, 0])


# ---------------------------------- main ------------------------------------ #

if __name__ == "__main__":
    # Small deterministic shapes. nIn == nOut so the residual add is active.
    # N*L = 128 (lane-aligned folded slab), n = n1 = 8 (f32 sublane-aligned).
    nIn, nOut = 32, 32
    N, L = 2, 64

    key = jax.random.PRNGKey(0)
    kx, kp = jax.random.split(key)
    x = jax.random.normal(kx, (N, nIn, L), jnp.float32)   # PyTorch NCL input

    torch_p, kern_p = init_params(kp, nIn, nOut)

    out = jax.block_until_ready(dilated_parallel_residual_block_b(x, kern_p, add=True))
    ref = jax.block_until_ready(reference_forward(x, torch_p, add=True))

    assert out.shape == (N, nOut, L)
    # All-f32 math (f32 MXU accumulation); tolerance still tight enough to catch
    # any structural error (wrong taps / masks / combined-weight layout / stats).
    np.testing.assert_allclose(np.asarray(out), np.asarray(ref), rtol=1e-2, atol=1e-2)
    print("KERNEL_OK")
</pallas_src>

<mosaic_0001>
module attributes {stable_mosaic.version = 11 : i64} {
  func.func @_block_kernel(%arg0: memref<2x32x64xf32, #tpu.memory_space<vmem>>, %arg1: memref<8x32xf32, #tpu.memory_space<vmem>>, %arg2: memref<8x1xf32, #tpu.memory_space<vmem>>, %arg3: memref<8x1xf32, #tpu.memory_space<vmem>>, %arg4: memref<1x1xf32, #tpu.memory_space<smem>>, %arg5: memref<32x72xf32, #tpu.memory_space<vmem>>, %arg6: memref<32x1xf32, #tpu.memory_space<vmem>>, %arg7: memref<32x1xf32, #tpu.memory_space<vmem>>, %arg8: memref<1x1xf32, #tpu.memory_space<smem>>, %arg9: memref<2x32x64xf32, #tpu.memory_space<vmem>>) attributes {dimension_semantics = [], scalar_prefetch = 0 : i64, scratch_operands = 0 : i64, tpu.core_type = #tpu.core_type<tc>} {
    %c0 = arith.constant 0 : index
    %c0_0 = arith.constant 0 : index
    %0 = memref.load %arg4[%c0, %c0_0] : memref<1x1xf32, #tpu.memory_space<smem>>
    %c0_1 = arith.constant 0 : index
    %c0_2 = arith.constant 0 : index
    %1 = memref.load %arg8[%c0_1, %c0_2] : memref<1x1xf32, #tpu.memory_space<smem>>
    %c0_3 = arith.constant 0 : index
    %c0_4 = arith.constant 0 : index
    %c0_5 = arith.constant 0 : index
    %2 = vector.load %arg0[%c0_3, %c0_4, %c0_5] : memref<2x32x64xf32, #tpu.memory_space<vmem>>, vector<1x32x64xf32>
    %3 = vector.shape_cast %2 : vector<1x32x64xf32> to vector<32x64xf32>
    %c1 = arith.constant 1 : index
    %c0_6 = arith.constant 0 : index
    %c0_7 = arith.constant 0 : index
    %4 = vector.load %arg0[%c1, %c0_6, %c0_7] : memref<2x32x64xf32, #tpu.memory_space<vmem>>, vector<1x32x64xf32>
    %5 = vector.shape_cast %4 : vector<1x32x64xf32> to vector<32x64xf32>
    %6 = tpu.concatenate %3, %5 in 1 : vector<32x64xf32>, vector<32x64xf32> -> vector<32x128xf32>
    %c0_8 = arith.constant 0 : index
    %c0_9 = arith.constant 0 : index
    %7 = vector.load %arg1[%c0_8, %c0_9] : memref<8x32xf32, #tpu.memory_space<vmem>>, vector<8x32xf32>
    %cst = arith.constant dense<0.000000e+00> : vector<8x128xf32>
    %8 = tpu.matmul %7, %6, %cst {dimension_numbers = #tpu.dot_dimension_numbers<[1], [0], [0], [1], [0, 0, 1, 1], [], []>} : vector<8x32xf32>, vector<32x128xf32>, vector<8x128xf32> -> vector<8x128xf32>
    %cst_10 = arith.constant dense<0.000000e+00> : vector<8xf32>
    %9 = vector.multi_reduction <add>, %8, %cst_10 [1] : vector<8x128xf32> to vector<8xf32>
    %10 = vector.shape_cast %9 : vector<8xf32> to vector<8x1xf32>
    %11 = arith.mulf %8, %8 : vector<8x128xf32>
    %cst_11 = arith.constant dense<0.000000e+00> : vector<8xf32>
    %12 = vector.multi_reduction <add>, %11, %cst_11 [1] : vector<8x128xf32> to vector<8xf32>
    %13 = vector.shape_cast %12 : vector<8xf32> to vector<8x1xf32>
    %cst_12 = arith.constant 7.812500e-03 : f32
    %14 = vector.broadcast %cst_12 : f32 to vector<8x1xf32>
    %15 = arith.mulf %10, %14 : vector<8x1xf32>
    %cst_13 = arith.constant 7.812500e-03 : f32
    %16 = vector.broadcast %cst_13 : f32 to vector<8x1xf32>
    %17 = arith.mulf %13, %16 : vector<8x1xf32>
    %18 = arith.mulf %15, %15 : vector<8x1xf32>
    %19 = arith.subf %17, %18 : vector<8x1xf32>
    %cst_14 = arith.constant 9.99999974E-6 : f32
    %20 = vector.broadcast %cst_14 : f32 to vector<8x1xf32>
    %21 = arith.addf %19, %20 : vector<8x1xf32>
    %22 = math.rsqrt %21 : vector<8x1xf32>
    %c0_15 = arith.constant 0 : index
    %c0_16 = arith.constant 0 : index
    %23 = vector.load %arg2[%c0_15, %c0_16] : memref<8x1xf32, #tpu.memory_space<vmem>>, vector<8x1xf32>
    %24 = arith.mulf %22, %23 : vector<8x1xf32>
    %c0_17 = arith.constant 0 : index
    %c0_18 = arith.constant 0 : index
    %25 = vector.load %arg3[%c0_17, %c0_18] : memref<8x1xf32, #tpu.memory_space<vmem>>, vector<8x1xf32>
    %26 = arith.mulf %15, %24 : vector<8x1xf32>
    %27 = arith.subf %25, %26 : vector<8x1xf32>
    %28 = vector.broadcast %24 : vector<8x1xf32> to vector<8x128xf32>
    %29 = arith.mulf %8, %28 : vector<8x128xf32>
    %30 = vector.broadcast %27 : vector<8x1xf32> to vector<8x128xf32>
    %31 = arith.addf %29, %30 : vector<8x128xf32>
    %cst_19 = arith.constant 0.000000e+00 : f32
    %32 = vector.broadcast %cst_19 : f32 to vector<8x128xf32>
    %33 = arith.cmpf oge, %31, %32 : vector<8x128xf32>
    %34 = vector.broadcast %0 : f32 to vector<8x128xf32>
    %35 = arith.mulf %34, %31 : vector<8x128xf32>
    %36 = arith.select %33, %31, %35 : vector<8x128xi1>, vector<8x128xf32>
    %37 = tpu.iota {dimensions = array<i32: 1>} : vector<8x128xi32>
    %c64_i32 = arith.constant 64 : i32
    %c0_i32 = arith.constant 0 : i32
    %38 = arith.cmpi eq, %c64_i32, %c0_i32 : i32
    %c1_i32 = arith.constant 1 : i32
    %39 = arith.select %38, %c1_i32, %c64_i32 : i32
    %40 = vector.broadcast %39 : i32 to vector<8x128xi32>
    %41 = arith.remsi %37, %40 : vector<8x128xi32>
    %c0_i32_20 = arith.constant 0 : i32
    %42 = vector.broadcast %c0_i32_20 : i32 to vector<8x128xi32>
    %43 = arith.cmpi ne, %41, %42 : vector<8x128xi32>
    %c0_i32_21 = arith.constant 0 : i32
    %44 = vector.broadcast %c0_i32_21 : i32 to vector<8x128xi32>
    %45 = arith.cmpi slt, %41, %44 : vector<8x128xi32>
    %c0_i32_22 = arith.constant 0 : i32
    %46 = arith.cmpi slt, %39, %c0_i32_22 : i32
    %47 = vector.broadcast %46 : i1 to vector<8x128xi1>
    %48 = vector.broadcast %47 : vector<8x128xi1> to vector<8x128xi1>
    %49 = arith.xori %45, %48 : vector<8x128xi1>
    %50 = arith.andi %49, %43 : vector<8x128xi1>
    %51 = vector.broadcast %39 : i32 to vector<8x128xi32>
    %52 = arith.addi %41, %51 : vector<8x128xi32>
    %53 = arith.select %50, %52, %41 : vector<8x128xi1>, vector<8x128xi32>
    %c1_i32_23 = arith.constant 1 : i32
    %54 = vector.broadcast %c1_i32_23 : i32 to vector<8x128xi32>
    %55 = arith.cmpi sge, %53, %54 : vector<8x128xi32>
    %c1_i32_24 = arith.constant 1 : i32
    %56 = tpu.dynamic_rotate %36 by %c1_i32_24 dim 1 : vector<8x128xf32>, i32 -> vector<8x128xf32>
    %cst_25 = arith.constant 0.000000e+00 : f32
    %57 = vector.broadcast %cst_25 : f32 to vector<8x128xf32>
    %58 = arith.select %55, %56, %57 : vector<8x128xi1>, vector<8x128xf32>
    %c63_i32 = arith.constant 63 : i32
    %59 = vector.broadcast %c63_i32 : i32 to vector<8x128xi32>
    %60 = arith.cmpi slt, %53, %59 : vector<8x128xi32>
    %c127_i32 = arith.constant 127 : i32
    %61 = tpu.dynamic_rotate %36 by %c127_i32 dim 1 : vector<8x128xf32>, i32 -> vector<8x128xf32>
    %cst_26 = arith.constant 0.000000e+00 : f32
    %62 = vector.broadcast %cst_26 : f32 to vector<8x128xf32>
    %63 = arith.select %60, %61, %62 : vector<8x128xi1>, vector<8x128xf32>
    %c2_i32 = arith.constant 2 : i32
    %64 = vector.broadcast %c2_i32 : i32 to vector<8x128xi32>
    %65 = arith.cmpi sge, %53, %64 : vector<8x128xi32>
    %c2_i32_27 = arith.constant 2 : i32
    %66 = tpu.dynamic_rotate %36 by %c2_i32_27 dim 1 : vector<8x128xf32>, i32 -> vector<8x128xf32>
    %cst_28 = arith.constant 0.000000e+00 : f32
    %67 = vector.broadcast %cst_28 : f32 to vector<8x128xf32>
    %68 = arith.select %65, %66, %67 : vector<8x128xi1>, vector<8x128xf32>
    %c62_i32 = arith.constant 62 : i32
    %69 = vector.broadcast %c62_i32 : i32 to vector<8x128xi32>
    %70 = arith.cmpi slt, %53, %69 : vector<8x128xi32>
    %c126_i32 = arith.constant 126 : i32
    %71 = tpu.dynamic_rotate %36 by %c126_i32 dim 1 : vector<8x128xf32>, i32 -> vector<8x128xf32>
    %cst_29 = arith.constant 0.000000e+00 : f32
    %72 = vector.broadcast %cst_29 : f32 to vector<8x128xf32>
    %73 = arith.select %70, %71, %72 : vector<8x128xi1>, vector<8x128xf32>
    %c4_i32 = arith.constant 4 : i32
    %74 = vector.broadcast %c4_i32 : i32 to vector<8x128xi32>
    %75 = arith.cmpi sge, %53, %74 : vector<8x128xi32>
    %c4_i32_30 = arith.constant 4 : i32
    %76 = tpu.dynamic_rotate %36 by %c4_i32_30 dim 1 : vector<8x128xf32>, i32 -> vector<8x128xf32>
    %cst_31 = arith.constant 0.000000e+00 : f32
    %77 = vector.broadcast %cst_31 : f32 to vector<8x128xf32>
    %78 = arith.select %75, %76, %77 : vector<8x128xi1>, vector<8x128xf32>
    %c60_i32 = arith.constant 60 : i32
    %79 = vector.broadcast %c60_i32 : i32 to vector<8x128xi32>
    %80 = arith.cmpi slt, %53, %79 : vector<8x128xi32>
    %c124_i32 = arith.constant 124 : i32
    %81 = tpu.dynamic_rotate %36 by %c124_i32 dim 1 : vector<8x128xf32>, i32 -> vector<8x128xf32>
    %cst_32 = arith.constant 0.000000e+00 : f32
    %82 = vector.broadcast %cst_32 : f32 to vector<8x128xf32>
    %83 = arith.select %80, %81, %82 : vector<8x128xi1>, vector<8x128xf32>
    %c8_i32 = arith.constant 8 : i32
    %84 = vector.broadcast %c8_i32 : i32 to vector<8x128xi32>
    %85 = arith.cmpi sge, %53, %84 : vector<8x128xi32>
    %c8_i32_33 = arith.constant 8 : i32
    %86 = tpu.dynamic_rotate %36 by %c8_i32_33 dim 1 : vector<8x128xf32>, i32 -> vector<8x128xf32>
    %cst_34 = arith.constant 0.000000e+00 : f32
    %87 = vector.broadcast %cst_34 : f32 to vector<8x128xf32>
    %88 = arith.select %85, %86, %87 : vector<8x128xi1>, vector<8x128xf32>
    %c56_i32 = arith.constant 56 : i32
    %89 = vector.broadcast %c56_i32 : i32 to vector<8x128xi32>
    %90 = arith.cmpi slt, %53, %89 : vector<8x128xi32>
    %c120_i32 = arith.constant 120 : i32
    %91 = tpu.dynamic_rotate %36 by %c120_i32 dim 1 : vector<8x128xf32>, i32 -> vector<8x128xf32>
    %cst_35 = arith.constant 0.000000e+00 : f32
    %92 = vector.broadcast %cst_35 : f32 to vector<8x128xf32>
    %93 = arith.select %90, %91, %92 : vector<8x128xi1>, vector<8x128xf32>
    %94 = tpu.concatenate %36, %58, %63, %68, %73, %78, %83, %88, %93 in 0 : vector<8x128xf32>, vector<8x128xf32>, vector<8x128xf32>, vector<8x128xf32>, vector<8x128xf32>, vector<8x128xf32>, vector<8x128xf32>, vector<8x128xf32>, vector<8x128xf32> -> vector<72x128xf32>
    %c0_36 = arith.constant 0 : index
    %c0_37 = arith.constant 0 : index
    %95 = vector.load %arg5[%c0_36, %c0_37] : memref<32x72xf32, #tpu.memory_space<vmem>>, vector<32x72xf32>
    %cst_38 = arith.constant dense<0.000000e+00> : vector<32x128xf32>
    %96 = tpu.matmul %95, %94, %cst_38 {dimension_numbers = #tpu.dot_dimension_numbers<[1], [0], [0], [1], [0, 0, 1, 1], [], []>} : vector<32x72xf32>, vector<72x128xf32>, vector<32x128xf32> -> vector<32x128xf32>
    %97 = arith.addf %96, %6 : vector<32x128xf32>
    %cst_39 = arith.constant dense<0.000000e+00> : vector<32xf32>
    %98 = vector.multi_reduction <add>, %97, %cst_39 [1] : vector<32x128xf32> to vector<32xf32>
    %99 = vector.shape_cast %98 : vector<32xf32> to vector<32x1xf32>
    %100 = arith.mulf %97, %97 : vector<32x128xf32>
    %cst_40 = arith.constant dense<0.000000e+00> : vector<32xf32>
    %101 = vector.multi_reduction <add>, %100, %cst_40 [1] : vector<32x128xf32> to vector<32xf32>
    %102 = vector.shape_cast %101 : vector<32xf32> to vector<32x1xf32>
    %cst_41 = arith.constant 7.812500e-03 : f32
    %103 = vector.broadcast %cst_41 : f32 to vector<32x1xf32>
    %104 = arith.mulf %99, %103 : vector<32x1xf32>
    %cst_42 = arith.constant 7.812500e-03 : f32
    %105 = vector.broadcast %cst_42 : f32 to vector<32x1xf32>
    %106 = arith.mulf %102, %105 : vector<32x1xf32>
    %107 = arith.mulf %104, %104 : vector<32x1xf32>
    %108 = arith.subf %106, %107 : vector<32x1xf32>
    %cst_43 = arith.constant 9.99999974E-6 : f32
    %109 = vector.broadcast %cst_43 : f32 to vector<32x1xf32>
    %110 = arith.addf %108, %109 : vector<32x1xf32>
    %111 = math.rsqrt %110 : vector<32x1xf32>
    %c0_44 = arith.constant 0 : index
    %c0_45 = arith.constant 0 : index
    %112 = vector.load %arg6[%c0_44, %c0_45] : memref<32x1xf32, #tpu.memory_space<vmem>>, vector<32x1xf32>
    %113 = arith.mulf %111, %112 : vector<32x1xf32>
    %c0_46 = arith.constant 0 : index
    %c0_47 = arith.constant 0 : index
    %114 = vector.load %arg7[%c0_46, %c0_47] : memref<32x1xf32, #tpu.memory_space<vmem>>, vector<32x1xf32>
    %115 = arith.mulf %104, %113 : vector<32x1xf32>
    %116 = arith.subf %114, %115 : vector<32x1xf32>
    %117 = vector.broadcast %113 : vector<32x1xf32> to vector<32x128xf32>
    %118 = arith.mulf %97, %117 : vector<32x128xf32>
    %119 = vector.broadcast %116 : vector<32x1xf32> to vector<32x128xf32>
    %120 = arith.addf %118, %119 : vector<32x128xf32>
    %cst_48 = arith.constant 0.000000e+00 : f32
    %121 = vector.broadcast %cst_48 : f32 to vector<32x128xf32>
    %122 = arith.cmpf oge, %120, %121 : vector<32x128xf32>
    %123 = vector.broadcast %1 : f32 to vector<32x128xf32>
    %124 = arith.mulf %123, %120 : vector<32x128xf32>
    %125 = arith.select %122, %120, %124 : vector<32x128xi1>, vector<32x128xf32>
    %126 = vector.extract_strided_slice %125 {offsets = [0, 0], sizes = [32, 64], strides = [1, 1]} : vector<32x128xf32> to vector<32x64xf32>
    %c0_49 = arith.constant 0 : index
    %c0_50 = arith.constant 0 : index
    %c0_51 = arith.constant 0 : index
    %127 = vector.load %arg9[%c0_49, %c0_50, %c0_51] : memref<2x32x64xf32, #tpu.memory_space<vmem>>, vector<1x32x64xf32>
    %128 = vector.shape_cast %127 : vector<1x32x64xf32> to vector<32x64xf32>
    %129 = vector.shape_cast %126 : vector<32x64xf32> to vector<1x32x64xf32>
    tpu.vector_store %arg9[%c0_49, %c0_50, %c0_51], %129 {strides = array<i32>} : memref<2x32x64xf32, #tpu.memory_space<vmem>>, vector<1x32x64xf32>,
    %130 = vector.extract_strided_slice %125 {offsets = [0, 64], sizes = [32, 64], strides = [1, 1]} : vector<32x128xf32> to vector<32x64xf32>
    %c1_52 = arith.constant 1 : index
    %c0_53 = arith.constant 0 : index
    %c0_54 = arith.constant 0 : index
    %131 = vector.load %arg9[%c1_52, %c0_53, %c0_54] : memref<2x32x64xf32, #tpu.memory_space<vmem>>, vector<1x32x64xf32>
    %132 = vector.shape_cast %131 : vector<1x32x64xf32> to vector<32x64xf32>
    %133 = vector.shape_cast %130 : vector<32x64xf32> to vector<1x32x64xf32>
    tpu.vector_store %arg9[%c1_52, %c0_53, %c0_54], %133 {strides = array<i32>} : memref<2x32x64xf32, #tpu.memory_space<vmem>>, vector<1x32x64xf32>,
    return
  }
}

</mosaic_0001>

<bundles_post_ra>
// kernel: tpu_custom_call.1
= control target key start
LH: loop header
LB: loop body
LE: loop exit
PB: predicated region body
PF: predicated region fallthrough
CT: control target
= control target key end

     0   :  { %16 = vsyncpa [#allocation5], 0  ;;  %s907_s0 = inlined_call_operand.vmem [shape: f32[2,32,64], index: 0, kind: input, shape index: {}]   ;;  %s908_s1 = inlined_call_operand.hbm [shape: f32[8,32], index: 1, kind: input, shape index: {}]   ;;  %s909_s2 = inlined_call_operand.vmem [shape: f32[8,1], index: 2, kind: input, shape index: {}]   ;;  %s910_s3 = inlined_call_operand.vmem [shape: f32[8,1], index: 3, kind: input, shape index: {}]   ;;  %s911_s4 = inlined_call_operand.<no memory space> [shape: f32[1,1], index: 4, kind: input, shape index: {}]   ;;  %s912_s5 = inlined_call_operand.vmem [shape: f32[32,72], index: 5, kind: input, shape index: {}]   ;;  %s913_s6 = inlined_call_operand.vmem [shape: f32[32,1], index: 6, kind: input, shape index: {}]   ;;  %s914_s7 = inlined_call_operand.vmem [shape: f32[32,1], index: 7, kind: input, shape index: {}]   ;;  %s915_s8 = inlined_call_operand.<no memory space> [shape: f32[1,1], index: 8, kind: input, shape index: {}]   ;;  %s916_s9 = inlined_call_operand.hbm [shape: f32[2,32,64], index: 9, kind: output, shape index: {}]  }
   0x1   :  { %17 = vsyncpa [#allocation6], 0  ;;  %s678_s30 = smov [#allocation4]   ;;  %s630_s13 = scalar_lea.hbm %s908_s1, 128 }
   0x2   :  { %s26_s10 = sshll.u32 %s678_s30, 4  ;;  %p631_p0 = scmp.ne.s32.totalorder %s908_s1, %s630_s13  ;;  %s27_s10 = int_to_ptr.vmem [resolvable:$true] %s26_s10 }
   0x3   :  { %p634_p1 = scmp.lt.u32.totalorder %s630_s13, %s908_s1 }
   0x5   :  { %p636_p2 = pnand %p634_p1, %p631_p0 }
   0x7   :  { %639 = shalt.err (!%p636_p2)
}
   0x8   :  { %s640_s18 = scalar_lea.vmem %s27_s10, 128  ;;  %p645_p4 = scmp.lt.s32.totalorder %s27_s10, %s27_s10 }
   0x9   :  { %p641_p3 = scmp.ne.s32.totalorder %s27_s10, %s640_s18  ;;  %p646_p5 = scmp.lt.s32.totalorder %s640_s18, %s640_s18 }
   0xb   :  { %p647_p6 = por %p646_p5, %p645_p4 }
   0xd   :  { %p648_p7 = pnand %p647_p6, %p641_p3 }
   0xf   :  { %651 = shalt.err (!%p648_p7)
}
  0x10   :  { %29 = dma.hbm_to_vmem [thread:$0]  %s908_s1, 128, %s27_s10, [#allocation5]  }
  0x11   :  { %674 = dma.done.wait [#allocation5], 128  }
  0x12   :  { %675 = vsyncadd [#allocation5], 4294967168  ;;  %v679_v0 = vmov 0.0|0.0   ;;  %v503_v1 = vld [vmem:[%s907_s0 + $0x30] sm:$0xff]  ;;  %v501_v2 = vld [vmem:[%s907_s0 + $0x20] sm:$0xff]  ;;  %vm680_vm0 = vmmov 0   ;;  %v183_v40 = vstv %s911_s4  ;;  %v186_v46 = vlaneseq }
  0x13   :  { %571 = vmatprep.subr.bf16.mxu0 %v679_v0  ;;  %v681_v3 = vmov 0.0   ;;  %s682_s25 = smov 64   ;;  %v504_v4 = vld [vmem:[%s907_s0 + $0x38] sm:$0xff]  ;;  %v502_v5 = vld [vmem:[%s907_s0 + $0x28] sm:$0xff]  ;;  %vm74_vm1 = vcmask 523264   ;;  %v49_v8 = vld [vmem:[%s907_s0] sm:$0xff] }
  0x14   :  { %544 = vmatprep.mubr.msk.f32.mxu0 %vm680_vm0, %v681_v3  ;;  %66 = vrot.lane.b32.xlu1 %v503_v1, %s682_s25  ;;  %v50_v9 = vld [vmem:[%s907_s0 + $0x8] sm:$0xff]  ;;  %v51_v10 = vld [vmem:[%s907_s0 + $0x10] sm:$0xff]  ;;  %v52_v12 = vld [vmem:[%s907_s0 + $0x18] sm:$0xff]  ;;  %vm80_vm2 = vcmask 261120   ;;  %v683_v24 = vmov 0   ;;  %s685_s21 = smov 1  }
  0x15   :  { %62 = vrot.lane.b32.xlu0 %v501_v2, %s682_s25  ;;  %v79_v20 = vld [vmem:[#allocation4] sm:$0xff]  ;;  %619 = vset.pattern.permute.xlu1 %v683_v24  ;;  %s687_s22 = smov 2   ;;  %s688_s23 = smov 126   ;;  %vm236_vm4 = vcmask 588800   ;;  %v187_v47 = vand.u32 127, %v186_v46  ;;  %vm692_vm6 = vmmov 1  }
  0x16   :  { %618 = vset.pattern.permute.xlu0 %v683_v24  ;;  %v165_v32 = vld [vmem:[%s909_s2] sm:$0xff]  ;;  %s684_s2 = smov 8   ;;  %s689_s4 = smov 4   ;;  %v233_v61 = vld [vmem:[%s912_s5 + $0x8] sm:$0xff]  ;;  %v234_v62 = vld [vmem:[%s912_s5 + $0x10] sm:$0xff] }
  0x17   :  { %v167_v35 = vld [vmem:[%s910_s3] sm:$0xff]  ;;  %s686_s3 = smov 127   ;;  %s690_s26 = smov 124   ;;  %v192_v48 = vand.u32 63, %v187_v47  ;;  %v235_v63 = vld [vmem:[%s912_s5 + $0x18] sm:$0xff] }
  0x18   :  { %68 = vrot.lane.b32.xlu1 %v504_v4, %s682_s25  ;;  %v232_v45 = vld [vmem:[%s912_s5] sm:$0xff]  ;;  %s691_s27 = smov 120  }
  0x19   :  { %64 = vrot.lane.b32.xlu0 %v502_v5, %s682_s25  ;;  %565 = vmatprep.mubr.msk.f32.mxu1 %vm236_vm4, %v232_v45  ;;  %vm200_vm5 = vcmp.ge.s32.totalorder %v192_v48, 1  ;;  %vm204_vm8 = vcmp.lt.s32.totalorder %v192_v48, 63  ;;  %vm208_vm9 = vcmp.ge.s32.totalorder %v192_v48, 2  ;;  %vm212_vm11 = vcmp.lt.s32.totalorder %v192_v48, 62  ;;  %v386_v46 = vld [vmem:[%s914_s7] sm:$0xff] }
  0x1a   :  { %vm578_vm7 = vmpackc.low %vm200_vm5, %vm692_vm6  ;;  %vm216_vm12 = vcmp.ge.s32.totalorder %v192_v48, 4  ;;  %vm220_vm14 = vcmp.lt.s32.totalorder %v192_v48, 60  ;;  %vm224_vm15 = vcmp.ge.s32.totalorder %v192_v48, 8 }
  0x1b   :  { %vm584_vm10 = vmpackc.low %vm208_vm9, %vm204_vm8 }
  0x1c   :  { %vm590_vm13 = vmpackc.low %vm216_vm12, %vm212_vm11 }
  0x1d   :  { %vm596_vm0 = vmpackc.low %vm224_vm15, %vm220_vm14 }
  0x86   :  { %v67_v6 = vpop.permute.xlu1 %66 }
  0x87   :  { %v63_v7 = vpop.permute.xlu0 %62  ;;  %v794_v17 = vsel %vm74_vm1, %v51_v10, %v67_v6 }
  0x88   :  { %v786_v14 = vsel %vm74_vm1, %v49_v8, %v63_v7 }
  0x8a   :  { %v69_v11 = vpop.permute.xlu1 %68 }
  0x8b   :  { %v65_v13 = vpop.permute.xlu0 %64  ;;  %v797_v18 = vsel %vm74_vm1, %v52_v12, %v69_v11 }
  0x8c   :  { %v789_v15 = vsel %vm74_vm1, %v50_v9, %v65_v13  ;;  %v575_v19 = vpack.c.bf16 %v797_v18, %v794_v17 }
  0x8d   :  { %v572_v16 = vpack.c.bf16 %v789_v15, %v786_v14 }
  0x8f   :  { %573 = vmatpush3.bf16.msra.mxu0 %v572_v16 }
  0x90   :  { %574 = vmatprep.subr.bf16.mxu0 %v679_v0 }
  0x93   :  { %576 = vmatpush3.bf16.msra.mxu0 %v575_v19 }
  0x96   :  { %545 = vmatmul.mubr.msk.f32.vlgmr.msra.gmra.mrb[0].mxu0 %vm80_vm2, %v79_v20  ;;  %vm228_vm2 = vcmp.lt.s32.totalorder %v192_v48, 56 }
 0x169   :  { %v150_v21 = vpop.f32.mrb[0].mxu0 }
 0x16a   :  { %154 = vadd.xlane.f32.xlu0 %v150_v21  ;;  %v546_v22 = vpop.f32.mrb[1].mxu0  ;;  %v156_v23 = vmul.f32 %v150_v21, %v150_v21 }
 0x16c   :  { %157 = vadd.xlane.f32.xlu1 %v156_v23 }
 0x1f7   :  { %v155_v25 = vpop.xlane.xlu0 %154 }
 0x1f8   :  { %v159_v26 = vmul.f32 0.0078125, %v155_v25 }
 0x1f9   :  { %v158_v27 = vpop.xlane.xlu1 %157 }
 0x1fa   :  { %v161_v28 = vmul.f32 %v159_v26, %v159_v26  ;;  %v160_v29 = vmul.f32 0.0078125, %v158_v27 }
 0x1fc   :  { %v162_v30 = vsub.f32 %v160_v29, %v161_v28 }
 0x1fe   :  { %v163_v31 = vadd.f32 1e-05, %v162_v30 }
 0x200   :  { %620 = vrsqrt.f32 %v163_v31 }
 0x20a   :  { %v621_v33 = vpop.eup %620 }
 0x20b   :  { %v166_v34 = vmul.f32 %v621_v33, %v165_v32 }
 0x20d   :  { %172 = vperm.xlu0 %618, %v166_v34   ;;  %v168_v36 = vmul.f32 %v166_v34, %v159_v26 }
 0x20f   :  { %v169_v37 = vsub.f32 %v167_v35, %v168_v36 }
 0x211   :  { %178 = vperm.xlu1 %619, %v169_v37   ;;  %v378_v37 = vld [vmem:[%s913_s6] sm:$0xff] }
 0x28c   :  { %v173_v38 = vpop.permute.xlu0 %172 }
 0x28d   :  { %v175_v39 = vmul.f32 %v173_v38, %v150_v21 }
 0x290   :  { %v179_v41 = vpop.permute.xlu1 %178 }
 0x291   :  { %v181_v42 = vadd.f32 %v179_v41, %v175_v39 }
 0x293   :  { %vm182_vm3 = vcmp.ge.f32.partialorder %v181_v42, 0.0  ;;  %v184_v43 = vmul.f32 %v183_v40, %v181_v42  ;;  %v379_v40 = vld [vmem:[%s913_s6 + $0x8] sm:$0xff] }
 0x295   :  { %v185_v44 = vsel %vm182_vm3, %v181_v42, %v184_v43 }
 0x296   :  { %225 = vrot.lane.b32.xlu0 %v185_v44, %s684_s2  ;;  %201 = vrot.lane.b32.xlu1 %v185_v44, %s685_s21 }
 0x29a   :  { %205 = vrot.lane.b32.xlu1 %v185_v44, %s686_s3 }
 0x29e   :  { %209 = vrot.lane.b32.xlu1 %v185_v44, %s687_s22 }
 0x2a2   :  { %213 = vrot.lane.b32.xlu1 %v185_v44, %s688_s23 }
 0x2a6   :  { %217 = vrot.lane.b32.xlu1 %v185_v44, %s689_s4 }
 0x2aa   :  { %221 = vrot.lane.b32.xlu1 %v185_v44, %s690_s26 }
 0x2ae   :  { %229 = vrot.lane.b32.xlu1 %v185_v44, %s691_s27 }
 0x308   :  { %v202_v49 = vpop.permute.xlu1 %201  ;;  %v226_v57 = vpop.permute.xlu0 %225 }
 0x309   :  { %v577_v50 = vpack.c.bf16 %v202_v49, %v185_v44  ;;  %v380_v49 = vld [vmem:[%s913_s6 + $0x10] sm:$0xff] }
 0x30b   :  { %579 = vmatprep.subr.msk.bf16.mxu1 %vm578_vm7, %v577_v50 }
 0x30c   :  { %582 = vmatpush3.bf16.msk.msra.mxu1 %vm578_vm7, %v577_v50  ;;  %v206_v51 = vpop.permute.xlu1 %205 }
 0x310   :  { %v210_v52 = vpop.permute.xlu1 %209 }
 0x311   :  { %v583_v53 = vpack.c.bf16 %v210_v52, %v206_v51  ;;  %v381_v51 = vld [vmem:[%s913_s6 + $0x18] sm:$0xff] }
 0x313   :  { %585 = vmatprep.subr.msk.bf16.mxu1 %vm584_vm10, %v583_v53 }
 0x314   :  { %588 = vmatpush3.bf16.msk.msra.mxu1 %vm584_vm10, %v583_v53  ;;  %v214_v54 = vpop.permute.xlu1 %213 }
 0x318   :  { %v218_v55 = vpop.permute.xlu1 %217 }
 0x319   :  { %v589_v56 = vpack.c.bf16 %v218_v55, %v214_v54  ;;  %v388_v54 = vld [vmem:[%s914_s7 + $0x10] sm:$0xff] }
 0x31b   :  { %591 = vmatprep.subr.msk.bf16.mxu1 %vm590_vm13, %v589_v56 }
 0x31c   :  { %594 = vmatpush3.bf16.msk.msra.mxu1 %vm590_vm13, %v589_v56  ;;  %v222_v58 = vpop.permute.xlu1 %221 }
 0x31d   :  { %v595_v59 = vpack.c.bf16 %v226_v57, %v222_v58  ;;  %v387_v58 = vld [vmem:[%s914_s7 + $0x8] sm:$0xff] }
 0x31f   :  { %597 = vmatprep.subr.msk.bf16.mxu1 %vm596_vm0, %v595_v59 }
 0x320   :  { %600 = vmatpush3.bf16.msk.msra.mxu1 %vm596_vm0, %v595_v59  ;;  %v230_v60 = vpop.permute.xlu1 %229 }
 0x321   :  { %563 = vmatprep.subr.msk.mxu1 %vm228_vm2, %v230_v60 }
 0x324   :  { %564 = vmatpush3.msk.msra.mxu1 %vm228_vm2, %v230_v60 }
 0x325   :  { %566 = vmatmul.mubr.msk.f32.vlgmr.msra.gmra.mrb[0].mxu1 %vm236_vm4, %v233_v61 }
 0x326   :  { %568 = vmatprep.mubr.msk.f32.mxu1 %vm236_vm4, %v234_v62  ;;  %v389_v62 = vld [vmem:[%s914_s7 + $0x18] sm:$0xff]  ;;  %s693_s7 = smov [#allocation7]  }
 0x329   :  { %569 = vmatmul.mubr.msk.f32.gmra.mrb[2].mxu1 %vm236_vm4, %v235_v63 }
 0x3f8   :  { %v567_v0 = vpop.f32.mrb[0].mxu1 }
 0x3f9   :  { %v828_v1 = vadd.f32 %v567_v0, %v789_v15  ;;  %v315_v2 = vpop.f32.mrb[1].mxu1 }
 0x3fa   :  { %v831_v3 = vadd.f32 %v315_v2, %v786_v14 }
 0x3fb   :  { %336 = vadd.xlane.f32.xlu1 %v828_v1  ;;  %v343_v8 = vmul.f32 %v828_v1, %v828_v1 }
 0x3fc   :  { %v570_v4 = vpop.f32.mrb[2].mxu1  ;;  %334 = vadd.xlane.f32.xlu0 %v831_v3  ;;  %v342_v5 = vmul.f32 %v831_v3, %v831_v3 }
 0x3fd   :  { %v325_v6 = vpop.f32.mrb[3].mxu1  ;;  %v845_v10 = vadd.f32 %v570_v4, %v797_v18 }
 0x3fe   :  { %v838_v7 = vadd.f32 %v325_v6, %v794_v17 }
 0x3ff   :  { %346 = vadd.xlane.f32.xlu1 %v342_v5  ;;  %v345_v11 = vmul.f32 %v845_v10, %v845_v10  ;;  %v450_v5 = vstv %s915_s8  ;;  %s489_s8 = sshll.u32 %s693_s7, 4  ;;  %s490_s8 = int_to_ptr.vmem [resolvable:$true] %s489_s8 }
 0x400   :  { %348 = vadd.xlane.f32.xlu0 %v343_v8  ;;  %v344_v9 = vmul.f32 %v838_v7, %v838_v7  ;;  %s652_s26 = scalar_lea.vmem %s490_s8, 1024  ;;  %p657_p9 = scmp.lt.s32.totalorder %s490_s8, %s490_s8 }
 0x401   :  { %p653_p8 = scmp.ne.s32.totalorder %s490_s8, %s652_s26  ;;  %p658_p10 = scmp.lt.s32.totalorder %s652_s26, %s652_s26 }
 0x403   :  { %350 = vadd.xlane.f32.xlu1 %v344_v9  ;;  %p659_p11 = por %p658_p10, %p657_p9 }
 0x404   :  { %340 = vadd.xlane.f32.xlu0 %v845_v10 }
 0x405   :  { %p660_p12 = pnand %p659_p11, %p653_p8 }
 0x408   :  { %338 = vadd.xlane.f32.xlu0 %v838_v7 }
 0x40c   :  { %352 = vadd.xlane.f32.xlu0 %v345_v11 }
 0x488   :  { %v337_v12 = vpop.xlane.xlu1 %336 }
 0x489   :  { %v335_v13 = vpop.xlane.xlu0 %334  ;;  %v355_v14 = vmul.f32 0.0078125, %v337_v12 }
 0x48a   :  { %v354_v15 = vmul.f32 0.0078125, %v335_v13 }
 0x48b   :  { %v363_v21 = vmul.f32 %v355_v14, %v355_v14 }
 0x48c   :  { %v362_v16 = vmul.f32 %v354_v15, %v354_v15  ;;  %v347_v17 = vpop.xlane.xlu1 %346 }
 0x48d   :  { %v358_v19 = vmul.f32 0.0078125, %v347_v17  ;;  %v349_v20 = vpop.xlane.xlu0 %348 }
 0x48e   :  { %v359_v18 = vmul.f32 0.0078125, %v349_v20 }
 0x48f   :  { %v366_v22 = vsub.f32 %v358_v19, %v362_v16 }
 0x490   :  { %v367_v23 = vsub.f32 %v359_v18, %v363_v21  ;;  %v351_v27 = vpop.xlane.xlu1 %350 }
 0x491   :  { %v370_v24 = vadd.f32 1e-05, %v366_v22  ;;  %v341_v25 = vpop.xlane.xlu0 %340  ;;  %v360_v31 = vmul.f32 0.0078125, %v351_v27 }
 0x492   :  { %v371_v26 = vadd.f32 1e-05, %v367_v23  ;;  %v357_v29 = vmul.f32 0.0078125, %v341_v25 }
 0x493   :  { %622 = vrsqrt.f32 %v370_v24 }
 0x494   :  { %624 = vrsqrt.f32 %v371_v26  ;;  %v365_v34 = vmul.f32 %v357_v29, %v357_v29 }
 0x495   :  { %v339_v28 = vpop.xlane.xlu0 %338 }
 0x496   :  { %v356_v30 = vmul.f32 0.0078125, %v339_v28 }
 0x498   :  { %v364_v32 = vmul.f32 %v356_v30, %v356_v30 }
 0x499   :  { %v353_v33 = vpop.xlane.xlu0 %352 }
 0x49a   :  { %v368_v35 = vsub.f32 %v360_v31, %v364_v32  ;;  %v361_v36 = vmul.f32 0.0078125, %v353_v33 }
 0x49c   :  { %v372_v38 = vadd.f32 1e-05, %v368_v35  ;;  %v369_v39 = vsub.f32 %v361_v36, %v365_v34 }
 0x49d   :  { %v623_v41 = vpop.eup %622 }
 0x49e   :  { %v625_v42 = vpop.eup %624  ;;  %626 = vrsqrt.f32 %v372_v38  ;;  %v373_v43 = vadd.f32 1e-05, %v369_v39  ;;  %v382_v44 = vmul.f32 %v623_v41, %v378_v37 }
 0x49f   :  { %v383_v45 = vmul.f32 %v625_v42, %v379_v40 }
 0x4a0   :  { %628 = vrsqrt.f32 %v373_v43  ;;  %400 = vperm.xlu1 %619, %v382_v44   ;;  %v390_v47 = vmul.f32 %v382_v44, %v354_v15 }
 0x4a1   :  { %405 = vperm.xlu0 %618, %v383_v45   ;;  %v391_v57 = vmul.f32 %v383_v45, %v355_v14 }
 0x4a2   :  { %v394_v48 = vsub.f32 %v386_v46, %v390_v47 }
 0x4a3   :  { %v395_v60 = vsub.f32 %v387_v58, %v391_v57 }
 0x4a5   :  { %424 = vperm.xlu0 %618, %v394_v48  }
 0x4a8   :  { %v627_v50 = vpop.eup %626 }
 0x4a9   :  { %v384_v52 = vmul.f32 %v627_v50, %v380_v49 }
 0x4aa   :  { %v629_v53 = vpop.eup %628 }
 0x4ab   :  { %v392_v55 = vmul.f32 %v384_v52, %v356_v30  ;;  %v385_v56 = vmul.f32 %v629_v53, %v381_v51 }
 0x4ad   :  { %415 = vperm.xlu1 %619, %v385_v56   ;;  %v396_v59 = vsub.f32 %v388_v54, %v392_v55  ;;  %v393_v61 = vmul.f32 %v385_v56, %v357_v29 }
 0x4af   :  { %434 = vperm.xlu0 %618, %v396_v59   ;;  %v397_v63 = vsub.f32 %v389_v62, %v393_v61 }
 0x4b1   :  { %429 = vperm.xlu1 %619, %v395_v60  }
 0x4b5   :  { %410 = vperm.xlu1 %619, %v384_v52  }
 0x4b9   :  { %439 = vperm.xlu1 %619, %v397_v63  }
 0x51f   :  { %v401_v0 = vpop.permute.xlu1 %400 }
 0x520   :  { %v406_v2 = vpop.permute.xlu0 %405  ;;  %v418_v4 = vmul.f32 %v401_v0, %v831_v3 }
 0x521   :  { %v419_v13 = vmul.f32 %v406_v2, %v828_v1 }
 0x524   :  { %v425_v6 = vpop.permute.xlu0 %424 }
 0x525   :  { %v442_v8 = vadd.f32 %v425_v6, %v418_v4 }
 0x527   :  { %v451_v9 = vmul.f32 %v450_v5, %v442_v8  ;;  %vm446_vm3 = vcmp.ge.f32.partialorder %v442_v8, 0.0 }
 0x529   :  { %v455_v11 = vsel %vm446_vm3, %v442_v8, %v451_v9 }
 0x52a   :  { %467 = vrot.lane.b32.xlu0 %v455_v11, %s682_s25  ;;  %459 = vst.msk [vmem:[#allocation7] sm:$0xff] %vm74_vm1, %v455_v11 }
 0x52c   :  { %v416_v12 = vpop.permute.xlu1 %415 }
 0x52d   :  { %v421_v21 = vmul.f32 %v416_v12, %v845_v10 }
 0x52e   :  { %v435_v20 = vpop.permute.xlu0 %434 }
 0x530   :  { %v430_v14 = vpop.permute.xlu1 %429 }
 0x531   :  { %v443_v15 = vadd.f32 %v430_v14, %v419_v13 }
 0x533   :  { %v452_v16 = vmul.f32 %v450_v5, %v443_v15  ;;  %vm447_vm4 = vcmp.ge.f32.partialorder %v443_v15, 0.0 }
 0x534   :  { %v411_v3 = vpop.permute.xlu1 %410 }
 0x535   :  { %v420_v17 = vmul.f32 %v411_v3, %v838_v7  ;;  %v456_v19 = vsel %vm447_vm4, %v443_v15, %v452_v16 }
 0x536   :  { %469 = vrot.lane.b32.xlu1 %v456_v19, %s682_s25  ;;  %460 = vst.msk [vmem:[#allocation7 + $0x8] sm:$0xff] %vm74_vm1, %v456_v19 }
 0x537   :  { %v444_v18 = vadd.f32 %v435_v20, %v420_v17 }
 0x538   :  { %v440_v22 = vpop.permute.xlu1 %439 }
 0x539   :  { %v445_v23 = vadd.f32 %v440_v22, %v421_v21  ;;  %vm448_vm5 = vcmp.ge.f32.partialorder %v444_v18, 0.0  ;;  %v453_v1 = vmul.f32 %v450_v5, %v444_v18 }
 0x53b   :  { %v454_v24 = vmul.f32 %v450_v5, %v445_v23  ;;  %v457_v25 = vsel %vm448_vm5, %v444_v18, %v453_v1  ;;  %vm449_vm6 = vcmp.ge.f32.partialorder %v445_v23, 0.0 }
 0x53c   :  { %471 = vrot.lane.b32.xlu0 %v457_v25, %s682_s25  ;;  %461 = vst.msk [vmem:[#allocation7 + $0x10] sm:$0xff] %vm74_vm1, %v457_v25 }
 0x53d   :  { %v458_v7 = vsel %vm449_vm6, %v445_v23, %v454_v24 }
 0x53e   :  { %473 = vrot.lane.b32.xlu1 %v458_v7, %s682_s25  ;;  %462 = vst.msk [vmem:[#allocation7 + $0x18] sm:$0xff] %vm74_vm1, %v458_v7 }
 0x59c   :  { %v468_v26 = vpop.permute.xlu0 %467 }
 0x59d   :  { %480 = vst.msk [vmem:[#allocation7 + $0x20] sm:$0xff] %vm74_vm1, %v468_v26 }
 0x5a8   :  { %v470_v10 = vpop.permute.xlu1 %469 }
 0x5a9   :  { %481 = vst.msk [vmem:[#allocation7 + $0x28] sm:$0xff] %vm74_vm1, %v470_v10 }
 0x5ae   :  { %v472_v27 = vpop.permute.xlu0 %471 }
 0x5af   :  { %482 = vst.msk [vmem:[#allocation7 + $0x30] sm:$0xff] %vm74_vm1, %v472_v27 }
 0x5b0   :  { %v474_v28 = vpop.permute.xlu1 %473 }
 0x5b1   :  { %483 = vst.msk [vmem:[#allocation7 + $0x38] sm:$0xff] %vm74_vm1, %v474_v28 }
 0x5b2   :  { %663 = shalt.err (!%p660_p12)
}
 0x5b3   :  { %s664_s28 = scalar_lea.hbm %s916_s9, 1024 }
 0x5b4   :  { %p665_p13 = scmp.ne.s32.totalorder %s916_s9, %s664_s28  ;;  %p668_p0 = scmp.lt.u32.totalorder %s664_s28, %s916_s9 }
 0x5b6   :  { %p670_p1 = pnand %p668_p0, %p665_p13 }
 0x5b8   :  { %673 = shalt.err (!%p670_p1)
}
 0x5b9   :  { %s694_s12 = smov 128  }
 0x5ba   :  { %495 = dma.vmem_to_hbm [thread:$0]  %s490_s8, 1024, %s916_s9, [#allocation6], %s694_s12, %s694_s12, %s684_s2  }
 0x5bb   :  { %676 = dma.done.wait [#allocation6], 1024  }
 0x5bc   :  { %677 = vsyncadd [#allocation6], 4294966272 }
 0x5bd   :  { %499 = vsyncpa [#allocation5], 1 }
 0x5be   :  { %500 = vsyncpa [#allocation6], 1 }

</bundles_post_ra>
